<compile_context>
chip_gen: v6e
topology: v6e:2x2x1
jax: 0.10.0
libtpu: 0.0.40
codegen_flags: <defaults>
</compile_context>

<pallas_src>
import functools

import jax
import jax.numpy as jnp
from jax.experimental import pallas as pl
from jax.experimental.pallas import tpu as pltpu

_LANE = 128      # TPU lane width (last dim)
_SUBLANE = 8     # TPU sublane width (second-to-last dim)


def _round_up(x, m):
    return ((x + m - 1) // m) * m


def _fused_mlp_kernel(*refs, num_layers, dims_pad):
    """Fused MLP over one row tile.

    Ref order: x_ref, (w0, b0, ..., w_{L-1}, b_{L-1}), o_ref, h_even, h_odd.

    x_ref : (RT, dims_pad[0])           VMEM
    w_i   : (dims_pad[i], dims_pad[i+1]) VMEM   (zero-padded W.T)
    b_i   : (1, dims_pad[i+1])           VMEM   (zero-padded bias)
    o_ref : (RT, dims_pad[-1])           VMEM
    h_*   : (RT, max_hidden_pad) f32     VMEM scratch (ping-pong activations)
    """
    x_ref = refs[0]
    wb = refs[1:1 + 2 * num_layers]
    o_ref = refs[1 + 2 * num_layers]
    h_refs = refs[2 + 2 * num_layers:]

    cur = x_ref[...]
    for i in range(num_layers):
        w_ref, b_ref = wb[2 * i], wb[2 * i + 1]
        y = jnp.dot(cur, w_ref[...], preferred_element_type=jnp.float32)
        # Bias add (single broadcast per tile) + ReLU kept in f32.
        y = y + b_ref[...].astype(jnp.float32)
        if i < num_layers - 1:
            y = jnp.maximum(y, 0.0)
            h = h_refs[i % 2]
            dout = dims_pad[i + 1]                 # static, 128-aligned
            h[:, :dout] = y                        # activation stays in VMEM
            cur = h[:, :dout]
        else:
            o_ref[...] = y.astype(o_ref.dtype)


def init_mlp_params(key, input_dim, hidden_dim, output_dim, num_layers,
                    dtype=jnp.float32):
    """Synthetic params matching PyTorch Linear init. Weight stored as (in, out)."""
    h = [hidden_dim] * (num_layers - 1)
    dims_in = [input_dim] + h
    dims_out = h + [output_dim]
    params = []
    for n_in, n_out in zip(dims_in, dims_out):
        kw, kb, key = jax.random.split(key, 3)
        bound = 1.0 / (n_in ** 0.5)
        w = jax.random.uniform(kw, (n_in, n_out), dtype, -bound, bound)
        b = jax.random.uniform(kb, (1, n_out), dtype, -bound, bound)
        params.append((w, b))
    return params


def mlp_forward(x, params, *, row_tile=256):
    """x: (..., input_dim) -> (..., output_dim); ReLU on all but last layer."""
    lead = x.shape[:-1]
    d_in = x.shape[-1]
    x2d = x.reshape(-1, d_in)
    n = x2d.shape[0]

    num_layers = len(params)
    dims = [d_in] + [w.shape[1] for w, _ in params]
    dims_pad = [_round_up(d, _LANE) for d in dims]

    # Row tiling: tile must be a sublane multiple; pad rows up to a tile multiple.
    rt = min(row_tile, _round_up(n, _SUBLANE))
    n_pad = _round_up(n, rt)

    # Zero-pad input and params to lane-aligned shapes (padding is inert).
    x_pad = jnp.zeros((n_pad, dims_pad[0]), x.dtype).at[:n, :d_in].set(x2d)
    wb_pad = []
    for i, (w, b) in enumerate(params):
        w_p = (jnp.zeros((dims_pad[i], dims_pad[i + 1]), w.dtype)
               .at[:dims[i], :dims[i + 1]].set(w))
        b_p = (jnp.zeros((1, dims_pad[i + 1]), b.dtype)
               .at[:, :dims[i + 1]].set(b.reshape(1, -1)))
        wb_pad += [w_p, b_p]

    grid = (n_pad // rt,)

    in_specs = [pl.BlockSpec((rt, dims_pad[0]), lambda i: (i, 0))]
    for li in range(num_layers):
        in_specs.append(
            pl.BlockSpec((dims_pad[li], dims_pad[li + 1]), lambda i: (0, 0)))
        in_specs.append(
            pl.BlockSpec((1, dims_pad[li + 1]), lambda i: (0, 0)))
    out_spec = pl.BlockSpec((rt, dims_pad[-1]), lambda i: (i, 0))

    h_dim = max(dims_pad[1:-1], default=_LANE)
    scratch_shapes = [pltpu.VMEM((rt, h_dim), jnp.float32),
                      pltpu.VMEM((rt, h_dim), jnp.float32)]

    flops = sum(2 * n_pad * dims_pad[i] * dims_pad[i + 1]
                for i in range(num_layers))
    itemsize = jnp.dtype(x.dtype).itemsize
    bytes_accessed = (x_pad.size * itemsize
                      + sum(a.size * a.dtype.itemsize for a in wb_pad)
                      + n_pad * dims_pad[-1] * itemsize)

    kernel = functools.partial(_fused_mlp_kernel,
                               num_layers=num_layers,
                               dims_pad=tuple(dims_pad))

    out_pad = pl.pallas_call(
        kernel,
        out_shape=jax.ShapeDtypeStruct((n_pad, dims_pad[-1]), x.dtype),
        grid_spec=pltpu.PrefetchScalarGridSpec(
            num_scalar_prefetch=0,
            grid=grid,
            in_specs=in_specs,
            out_specs=out_spec,
            scratch_shapes=scratch_shapes),
        compiler_params=pltpu.CompilerParams(
            dimension_semantics=("parallel",)),
        cost_estimate=pl.CostEstimate(flops=flops, transcendentals=0,
                                      bytes_accessed=bytes_accessed),
    )(x_pad, *wb_pad)

    out = out_pad[:n, :dims[-1]]
    return out.reshape(*lead, dims[-1])


if __name__ == "__main__":
    key = jax.random.PRNGKey(0)
    kx, kp = jax.random.split(key)

    batch, seq = 2, 8
    input_dim, hidden_dim, output_dim, num_layers = 32, 64, 16, 3

    x = jax.random.normal(kx, (batch, seq, input_dim), dtype=jnp.float32)
    params = init_mlp_params(kp, input_dim, hidden_dim, output_dim, num_layers)

    out = mlp_forward(x, params)
    jax.block_until_ready(out)

    # Pure-JAX reference check (matches the PyTorch forward).
    ref = x.reshape(-1, input_dim)
    for i, (w, b) in enumerate(params):
        ref = ref @ w + b
        if i < num_layers - 1:
            ref = jnp.maximum(ref, 0.0)
    ref = ref.reshape(batch, seq, output_dim)

    assert out.shape == (batch, seq, output_dim)
    assert jnp.allclose(out, ref, atol=1e-5, rtol=1e-5)

    print("KERNEL_OK")
</pallas_src>

<mosaic_0001>
module attributes {stable_mosaic.version = 11 : i64} {
  func.func @_fused_mlp_kernel(%arg0: i32, %arg1: memref<16x128xf32, #tpu.memory_space<vmem>>, %arg2: memref<128x128xf32, #tpu.memory_space<vmem>>, %arg3: memref<1x128xf32, #tpu.memory_space<vmem>>, %arg4: memref<128x128xf32, #tpu.memory_space<vmem>>, %arg5: memref<1x128xf32, #tpu.memory_space<vmem>>, %arg6: memref<128x128xf32, #tpu.memory_space<vmem>>, %arg7: memref<1x128xf32, #tpu.memory_space<vmem>>, %arg8: memref<16x128xf32, #tpu.memory_space<vmem>>, %arg9: memref<16x128xf32, #tpu.memory_space<vmem>>, %arg10: memref<16x128xf32, #tpu.memory_space<vmem>>) attributes {dimension_semantics = [#tpu.dimension_semantics<parallel>], iteration_bounds = array<i64: 1>, scalar_prefetch = 0 : i64, scratch_operands = 2 : i64, tpu.core_type = #tpu.core_type<tc>, window_params = [{transform_indices = @transform_0, window_bounds = array<i64: 16, 128>}, {pipeline_mode = #tpu.pipeline_mode<synchronous>, transform_indices = @transform_1, window_bounds = array<i64: 128, 128>}, {pipeline_mode = #tpu.pipeline_mode<synchronous>, transform_indices = @transform_2, window_bounds = array<i64: 1, 128>}, {pipeline_mode = #tpu.pipeline_mode<synchronous>, transform_indices = @transform_3, window_bounds = array<i64: 128, 128>}, {pipeline_mode = #tpu.pipeline_mode<synchronous>, transform_indices = @transform_4, window_bounds = array<i64: 1, 128>}, {pipeline_mode = #tpu.pipeline_mode<synchronous>, transform_indices = @transform_5, window_bounds = array<i64: 128, 128>}, {pipeline_mode = #tpu.pipeline_mode<synchronous>, transform_indices = @transform_6, window_bounds = array<i64: 1, 128>}, {transform_indices = @transform_7, window_bounds = array<i64: 16, 128>}]} {
    %c0 = arith.constant 0 : index
    %c0_0 = arith.constant 0 : index
    %0 = vector.load %arg1[%c0, %c0_0] : memref<16x128xf32, #tpu.memory_space<vmem>>, vector<16x128xf32>
    %c0_1 = arith.constant 0 : index
    %c0_2 = arith.constant 0 : index
    %1 = vector.load %arg2[%c0_1, %c0_2] : memref<128x128xf32, #tpu.memory_space<vmem>>, vector<128x128xf32>
    %cst = arith.constant dense<0.000000e+00> : vector<16x128xf32>
    %2 = tpu.matmul %0, %1, %cst {dimension_numbers = #tpu.dot_dimension_numbers<[1], [0], [0], [1], [0, 0, 1, 1], [], []>} : vector<16x128xf32>, vector<128x128xf32>, vector<16x128xf32> -> vector<16x128xf32>
    %c0_3 = arith.constant 0 : index
    %c0_4 = arith.constant 0 : index
    %3 = vector.load %arg3[%c0_3, %c0_4] : memref<1x128xf32, #tpu.memory_space<vmem>>, vector<1x128xf32>
    %4 = vector.broadcast %3 : vector<1x128xf32> to vector<16x128xf32>
    %5 = arith.addf %2, %4 : vector<16x128xf32>
    %cst_5 = arith.constant 0.000000e+00 : f32
    %6 = vector.broadcast %cst_5 : f32 to vector<16x128xf32>
    %7 = arith.maximumf %5, %6 : vector<16x128xf32>
    %c0_6 = arith.constant 0 : index
    %c0_7 = arith.constant 0 : index
    %8 = vector.load %arg9[%c0_6, %c0_7] : memref<16x128xf32, #tpu.memory_space<vmem>>, vector<16x128xf32>
    tpu.vector_store %arg9[%c0_6, %c0_7], %7 {strides = array<i32>} : memref<16x128xf32, #tpu.memory_space<vmem>>, vector<16x128xf32>,
    %c0_8 = arith.constant 0 : index
    %c0_9 = arith.constant 0 : index
    %9 = vector.load %arg9[%c0_8, %c0_9] : memref<16x128xf32, #tpu.memory_space<vmem>>, vector<16x128xf32>
    %c0_10 = arith.constant 0 : index
    %c0_11 = arith.constant 0 : index
    %10 = vector.load %arg4[%c0_10, %c0_11] : memref<128x128xf32, #tpu.memory_space<vmem>>, vector<128x128xf32>
    %cst_12 = arith.constant dense<0.000000e+00> : vector<16x128xf32>
    %11 = tpu.matmul %9, %10, %cst_12 {dimension_numbers = #tpu.dot_dimension_numbers<[1], [0], [0], [1], [0, 0, 1, 1], [], []>} : vector<16x128xf32>, vector<128x128xf32>, vector<16x128xf32> -> vector<16x128xf32>
    %c0_13 = arith.constant 0 : index
    %c0_14 = arith.constant 0 : index
    %12 = vector.load %arg5[%c0_13, %c0_14] : memref<1x128xf32, #tpu.memory_space<vmem>>, vector<1x128xf32>
    %13 = vector.broadcast %12 : vector<1x128xf32> to vector<16x128xf32>
    %14 = arith.addf %11, %13 : vector<16x128xf32>
    %cst_15 = arith.constant 0.000000e+00 : f32
    %15 = vector.broadcast %cst_15 : f32 to vector<16x128xf32>
    %16 = arith.maximumf %14, %15 : vector<16x128xf32>
    %c0_16 = arith.constant 0 : index
    %c0_17 = arith.constant 0 : index
    %17 = vector.load %arg10[%c0_16, %c0_17] : memref<16x128xf32, #tpu.memory_space<vmem>>, vector<16x128xf32>
    tpu.vector_store %arg10[%c0_16, %c0_17], %16 {strides = array<i32>} : memref<16x128xf32, #tpu.memory_space<vmem>>, vector<16x128xf32>,
    %c0_18 = arith.constant 0 : index
    %c0_19 = arith.constant 0 : index
    %18 = vector.load %arg10[%c0_18, %c0_19] : memref<16x128xf32, #tpu.memory_space<vmem>>, vector<16x128xf32>
    %c0_20 = arith.constant 0 : index
    %c0_21 = arith.constant 0 : index
    %19 = vector.load %arg6[%c0_20, %c0_21] : memref<128x128xf32, #tpu.memory_space<vmem>>, vector<128x128xf32>
    %cst_22 = arith.constant dense<0.000000e+00> : vector<16x128xf32>
    %20 = tpu.matmul %18, %19, %cst_22 {dimension_numbers = #tpu.dot_dimension_numbers<[1], [0], [0], [1], [0, 0, 1, 1], [], []>} : vector<16x128xf32>, vector<128x128xf32>, vector<16x128xf32> -> vector<16x128xf32>
    %c0_23 = arith.constant 0 : index
    %c0_24 = arith.constant 0 : index
    %21 = vector.load %arg7[%c0_23, %c0_24] : memref<1x128xf32, #tpu.memory_space<vmem>>, vector<1x128xf32>
    %22 = vector.broadcast %21 : vector<1x128xf32> to vector<16x128xf32>
    %23 = arith.addf %20, %22 : vector<16x128xf32>
    %c0_25 = arith.constant 0 : index
    %c0_26 = arith.constant 0 : index
    %24 = vector.load %arg8[%c0_25, %c0_26] : memref<16x128xf32, #tpu.memory_space<vmem>>, vector<16x128xf32>
    tpu.vector_store %arg8[%c0_25, %c0_26], %23 {strides = array<i32>} : memref<16x128xf32, #tpu.memory_space<vmem>>, vector<16x128xf32>,
    return
  }
  func.func @transform_0(%arg0: i32) -> (i32, i32) {
    %c0_i32 = arith.constant 0 : i32
    %c0_i32_0 = arith.constant 0 : i32
    return %arg0, %c0_i32 : i32, i32
  }
  func.func @transform_1(%arg0: i32) -> (i32, i32) {
    %c0_i32 = arith.constant 0 : i32
    %c0_i32_0 = arith.constant 0 : i32
    %c0_i32_1 = arith.constant 0 : i32
    return %c0_i32, %c0_i32_0 : i32, i32
  }
  func.func @transform_2(%arg0: i32) -> (i32, i32) {
    %c0_i32 = arith.constant 0 : i32
    %c0_i32_0 = arith.constant 0 : i32
    %c0_i32_1 = arith.constant 0 : i32
    return %c0_i32, %c0_i32_0 : i32, i32
  }
  func.func @transform_3(%arg0: i32) -> (i32, i32) {
    %c0_i32 = arith.constant 0 : i32
    %c0_i32_0 = arith.constant 0 : i32
    %c0_i32_1 = arith.constant 0 : i32
    return %c0_i32, %c0_i32_0 : i32, i32
  }
  func.func @transform_4(%arg0: i32) -> (i32, i32) {
    %c0_i32 = arith.constant 0 : i32
    %c0_i32_0 = arith.constant 0 : i32
    %c0_i32_1 = arith.constant 0 : i32
    return %c0_i32, %c0_i32_0 : i32, i32
  }
  func.func @transform_5(%arg0: i32) -> (i32, i32) {
    %c0_i32 = arith.constant 0 : i32
    %c0_i32_0 = arith.constant 0 : i32
    %c0_i32_1 = arith.constant 0 : i32
    return %c0_i32, %c0_i32_0 : i32, i32
  }
  func.func @transform_6(%arg0: i32) -> (i32, i32) {
    %c0_i32 = arith.constant 0 : i32
    %c0_i32_0 = arith.constant 0 : i32
    %c0_i32_1 = arith.constant 0 : i32
    return %c0_i32, %c0_i32_0 : i32, i32
  }
  func.func @transform_7(%arg0: i32) -> (i32, i32) {
    %c0_i32 = arith.constant 0 : i32
    %c0_i32_0 = arith.constant 0 : i32
    return %arg0, %c0_i32 : i32, i32
  }
}

</mosaic_0001>

<bundles_post_ra>
// kernel: tpu_custom_call.1
= control target key start
LH: loop header
LB: loop body
LE: loop exit
PB: predicated region body
PF: predicated region fallthrough
CT: control target
= control target key end

     0   :  { %12 = vsyncpa [#allocation5], 0  ;;  %s774_s0 = inlined_call_operand.hbm [shape: f32[16,128], index: 0, kind: input, shape index: {}]   ;;  %s775_s1 = inlined_call_operand.hbm [shape: f32[128,128], index: 1, kind: input, shape index: {}]   ;;  %s776_s2 = inlined_call_operand.vmem [shape: f32[1,128], index: 2, kind: input, shape index: {}]   ;;  %s777_s3 = inlined_call_operand.hbm [shape: f32[128,128], index: 3, kind: input, shape index: {}]   ;;  %s778_s4 = inlined_call_operand.vmem [shape: f32[1,128], index: 4, kind: input, shape index: {}]   ;;  %s779_s5 = inlined_call_operand.hbm [shape: f32[128,128], index: 5, kind: input, shape index: {}]   ;;  %s780_s6 = inlined_call_operand.vmem [shape: f32[1,128], index: 6, kind: input, shape index: {}]   ;;  %s781_s7 = inlined_call_operand.hbm [shape: f32[16,128], index: 7, kind: output, shape index: {}]  }
   0x1   :  { %13 = vsyncpa [#allocation8], 0 }
   0x2   :  { %14 = vsyncpa [#allocation11], 0 }
   0x3   :  { %15 = vsyncpa [#allocation6], 0  ;;  %s688_s24 = smov [#allocation7]   ;;  %s689_s26 = smov [#allocation4]  }
   0x4   :  { %s33_s25 = sshll.u32 %s688_s24, 4  ;;  %s21_s27 = sshll.u32 %s689_s26, 4  ;;  %s34_s25 = int_to_ptr.vmem [resolvable:$true] %s33_s25  ;;  %s22_s27 = int_to_ptr.vmem [resolvable:$true] %s21_s27 }
   0x5   :  { %s588_s28 = scalar_lea.vmem %s34_s25, 2048  ;;  %p593_p1 = scmp.lt.s32.totalorder %s34_s25, %s34_s25 }
   0x6   :  { %p589_p0 = scmp.ne.s32.totalorder %s34_s25, %s588_s28  ;;  %p594_p2 = scmp.lt.s32.totalorder %s588_s28, %s588_s28 }
   0x8   :  { %p595_p3 = por %p594_p2, %p593_p1 }
   0xa   :  { %p596_p4 = pnand %p595_p3, %p589_p0 }
   0xc   :  { %599 = shalt.err (!%p596_p4)
}
   0xd   :  { %s690_s29 = smov 128   ;;  %s691_s30 = smov 8  }
   0xe   :  { %39 = dma.hbm_to_vmem [thread:$0]  %s775_s1, 2048, %s34_s25, [#allocation8], %s690_s29, %s690_s29, %s691_s30  }
   0xf   :  { %s608_s10 = scalar_lea.vmem %s22_s27, 256  ;;  %p613_p6 = scmp.lt.s32.totalorder %s22_s27, %s22_s27 }
  0x10   :  { %p609_p5 = scmp.ne.s32.totalorder %s22_s27, %s608_s10  ;;  %p614_p7 = scmp.lt.s32.totalorder %s608_s10, %s608_s10 }
  0x12   :  { %p615_p8 = por %p614_p7, %p613_p6 }
  0x14   :  { %p616_p9 = pnand %p615_p8, %p609_p5 }
  0x16   :  { %619 = shalt.err (!%p616_p9)
}
  0x17   :  { %27 = dma.hbm_to_vmem [thread:$0]  %s774_s0, 256, %s22_s27, [#allocation5], %s690_s29, %s690_s29, %s691_s30  }
  0x18   :  { %s692_s13 = smov [#allocation9]   ;;  %s693_s15 = smov [#allocation10]  }
  0x19   :  { %s47_s14 = sshll.u32 %s692_s13, 4  ;;  %s61_s16 = sshll.u32 %s693_s15, 4  ;;  %s48_s14 = int_to_ptr.vmem [resolvable:$true] %s47_s14  ;;  %s62_s16 = int_to_ptr.vmem [resolvable:$true] %s61_s16 }
  0x1a   :  { %s628_s1 = scalar_lea.vmem %s48_s14, 2048  ;;  %p633_p11 = scmp.lt.s32.totalorder %s48_s14, %s48_s14 }
  0x1b   :  { %p629_p10 = scmp.ne.s32.totalorder %s48_s14, %s628_s1  ;;  %p634_p12 = scmp.lt.s32.totalorder %s628_s1, %s628_s1 }
  0x1d   :  { %p635_p13 = por %p634_p12, %p633_p11 }
  0x1f   :  { %p636_p0 = pnand %p635_p13, %p629_p10 }
  0x21   :  { %639 = shalt.err (!%p636_p0)
}
  0x22   :  { %53 = dma.hbm_to_vmem [thread:$0]  %s777_s3, 2048, %s48_s14, [#allocation8], %s690_s29, %s690_s29, %s691_s30  }
  0x23   :  { %s648_s0 = scalar_lea.vmem %s62_s16, 2048  ;;  %p653_p2 = scmp.lt.s32.totalorder %s62_s16, %s62_s16 }
  0x24   :  { %p649_p1 = scmp.ne.s32.totalorder %s62_s16, %s648_s0  ;;  %p654_p3 = scmp.lt.s32.totalorder %s648_s0, %s648_s0 }
  0x26   :  { %p655_p4 = por %p654_p3, %p653_p2 }
  0x28   :  { %p656_p5 = pnand %p655_p4, %p649_p1 }
  0x2a   :  { %659 = shalt.err (!%p656_p5)
}
  0x2b   :  { %67 = dma.hbm_to_vmem [thread:$0]  %s779_s5, 2048, %s62_s16, [#allocation11], %s690_s29, %s690_s29, %s691_s30  }
  0x2c   :  { %680 = dma.done.wait [#allocation5], 256  }
  0x2d   :  { %681 = vsyncadd [#allocation5], 4294967040 }
  0x2e   :  { %682 = dma.done.wait [#allocation8], 4096  }
  0x2f   :  { %683 = vsyncadd [#allocation8], 4294963200 }
  0x30   :  { %684 = dma.done.wait [#allocation11], 2048  }
  0x31   :  { %685 = vsyncadd [#allocation11], 4294965248  ;;  %v99_v0 = vld [vmem:[#allocation7 + $0x78] sm:$0xff]  ;;  %v98_v1 = vld [vmem:[#allocation7 + $0x70] sm:$0xff]  ;;  %s694_s24 = smov [#allocation12]  }
  0x32   :  { %468 = vmatprep.subr.mxu0 %v99_v0  ;;  %v97_v2 = vld [vmem:[#allocation7 + $0x68] sm:$0xff]  ;;  %v96_v3 = vld [vmem:[#allocation7 + $0x60] sm:$0xff]  ;;  %v82_v4 = vld [vmem:[#allocation4] sm:$0xff]  ;;  %s397_s25 = sshll.u32 %s694_s24, 4  ;;  %s398_s25 = int_to_ptr.vmem [resolvable:$true] %s397_s25 }
  0x33   :  { %469 = vmatpush3.msra.mxu0 %v99_v0  ;;  %v95_v5 = vld [vmem:[#allocation7 + $0x58] sm:$0xff]  ;;  %500 = vmatprep.mubr.f32.mxu0 %v82_v4  ;;  %v202_v7 = vld [vmem:[#allocation9 + $0x70] sm:$0xff]  ;;  %v201_v9 = vld [vmem:[#allocation9 + $0x68] sm:$0xff]  ;;  %p665_p7 = scmp.lt.s32.totalorder %s398_s25, %s398_s25 }
  0x34   :  { %470 = vmatprep.subr.mxu0 %v98_v1  ;;  %v203_v6 = vld [vmem:[#allocation9 + $0x78] sm:$0xff]  ;;  %v94_v8 = vld [vmem:[#allocation7 + $0x50] sm:$0xff]  ;;  %v93_v10 = vld [vmem:[#allocation7 + $0x48] sm:$0xff] }
  0x35   :  { %471 = vmatpush3.msra.mxu0 %v98_v1  ;;  %503 = vmatprep.subr.mxu1 %v203_v6  ;;  %v200_v11 = vld [vmem:[#allocation9 + $0x60] sm:$0xff]  ;;  %v199_v13 = vld [vmem:[#allocation9 + $0x58] sm:$0xff]  ;;  %v198_v15 = vld [vmem:[#allocation9 + $0x50] sm:$0xff] }
  0x36   :  { %472 = vmatprep.subr.mxu0 %v97_v2  ;;  %504 = vmatpush3.msra.mxu1 %v203_v6  ;;  %v92_v12 = vld [vmem:[#allocation7 + $0x40] sm:$0xff]  ;;  %v91_v14 = vld [vmem:[#allocation7 + $0x38] sm:$0xff]  ;;  %v90_v16 = vld [vmem:[#allocation7 + $0x30] sm:$0xff] }
  0x37   :  { %473 = vmatpush3.msra.mxu0 %v97_v2  ;;  %505 = vmatprep.subr.mxu1 %v202_v7  ;;  %v197_v17 = vld [vmem:[#allocation9 + $0x48] sm:$0xff]  ;;  %v196_v19 = vld [vmem:[#allocation9 + $0x40] sm:$0xff]  ;;  %v195_v21 = vld [vmem:[#allocation9 + $0x38] sm:$0xff] }
  0x38   :  { %474 = vmatprep.subr.mxu0 %v96_v3  ;;  %506 = vmatpush3.msra.mxu1 %v202_v7  ;;  %v89_v18 = vld [vmem:[#allocation7 + $0x28] sm:$0xff]  ;;  %v88_v20 = vld [vmem:[#allocation7 + $0x20] sm:$0xff]  ;;  %v87_v22 = vld [vmem:[#allocation7 + $0x18] sm:$0xff] }
  0x39   :  { %475 = vmatpush3.msra.mxu0 %v96_v3  ;;  %507 = vmatprep.subr.mxu1 %v201_v9  ;;  %v194_v23 = vld [vmem:[#allocation9 + $0x30] sm:$0xff]  ;;  %v193_v25 = vld [vmem:[#allocation9 + $0x28] sm:$0xff]  ;;  %v192_v27 = vld [vmem:[#allocation9 + $0x20] sm:$0xff] }
  0x3a   :  { %476 = vmatprep.subr.mxu0 %v95_v5  ;;  %508 = vmatpush3.msra.mxu1 %v201_v9  ;;  %v86_v24 = vld [vmem:[#allocation7 + $0x10] sm:$0xff]  ;;  %v85_v26 = vld [vmem:[#allocation7 + $0x8] sm:$0xff]  ;;  %v84_v28 = vld [vmem:[#allocation7] sm:$0xff] }
  0x3b   :  { %477 = vmatpush3.msra.mxu0 %v95_v5  ;;  %509 = vmatprep.subr.mxu1 %v200_v11  ;;  %v83_v29 = vld [vmem:[#allocation4 + $0x8] sm:$0xff]  ;;  %v190_v31 = vld [vmem:[#allocation9 + $0x10] sm:$0xff]  ;;  %v189_v32 = vld [vmem:[#allocation9 + $0x8] sm:$0xff] }
  0x3c   :  { %478 = vmatprep.subr.mxu0 %v94_v8  ;;  %510 = vmatpush3.msra.mxu1 %v200_v11  ;;  %v191_v30 = vld [vmem:[#allocation9 + $0x18] sm:$0xff]  ;;  %v188_v33 = vld [vmem:[#allocation9] sm:$0xff]  ;;  %v306_v35 = vld [vmem:[#allocation10 + $0x70] sm:$0xff] }
  0x3d   :  { %479 = vmatpush3.msra.mxu0 %v94_v8  ;;  %511 = vmatprep.subr.mxu1 %v199_v13  ;;  %v307_v34 = vld [vmem:[#allocation10 + $0x78] sm:$0xff]  ;;  %v305_v36 = vld [vmem:[#allocation10 + $0x68] sm:$0xff]  ;;  %v304_v37 = vld [vmem:[#allocation10 + $0x60] sm:$0xff] }
  0x3e   :  { %480 = vmatprep.subr.mxu0 %v93_v10  ;;  %512 = vmatpush3.msra.mxu1 %v199_v13  ;;  %v303_v38 = vld [vmem:[#allocation10 + $0x58] sm:$0xff]  ;;  %v302_v39 = vld [vmem:[#allocation10 + $0x50] sm:$0xff]  ;;  %v301_v40 = vld [vmem:[#allocation10 + $0x48] sm:$0xff] }
  0x3f   :  { %481 = vmatpush3.msra.mxu0 %v93_v10  ;;  %513 = vmatprep.subr.mxu1 %v198_v15  ;;  %v300_v41 = vld [vmem:[#allocation10 + $0x40] sm:$0xff]  ;;  %v299_v42 = vld [vmem:[#allocation10 + $0x38] sm:$0xff]  ;;  %v298_v43 = vld [vmem:[#allocation10 + $0x30] sm:$0xff] }
  0x40   :  { %482 = vmatprep.subr.mxu0 %v92_v12  ;;  %514 = vmatpush3.msra.mxu1 %v198_v15  ;;  %v297_v44 = vld [vmem:[#allocation10 + $0x28] sm:$0xff]  ;;  %v296_v45 = vld [vmem:[#allocation10 + $0x20] sm:$0xff]  ;;  %v411_v46 = vld [vmem:[%s776_s2] ss:$0 sm:$0xff] }
  0x41   :  { %483 = vmatpush3.msra.mxu0 %v92_v12  ;;  %515 = vmatprep.subr.mxu1 %v197_v17  ;;  %v295_v53 = vld [vmem:[#allocation10 + $0x18] sm:$0xff]  ;;  %v294_v54 = vld [vmem:[#allocation10 + $0x10] sm:$0xff]  ;;  %v293_v55 = vld [vmem:[#allocation10 + $0x8] sm:$0xff] }
  0x42   :  { %484 = vmatprep.subr.mxu0 %v91_v14  ;;  %516 = vmatpush3.msra.mxu1 %v197_v17  ;;  %v292_v56 = vld [vmem:[#allocation10] sm:$0xff]  ;;  %v412_v57 = vld [vmem:[%s778_s4] ss:$0 sm:$0xff]  ;;  %s660_s4 = scalar_lea.vmem %s398_s25, 256 }
  0x43   :  { %485 = vmatpush3.msra.mxu0 %v91_v14  ;;  %517 = vmatprep.subr.mxu1 %v196_v19  ;;  %v413_v0 = vld [vmem:[%s780_s6] ss:$0 sm:$0xff]  ;;  %p661_p6 = scmp.ne.s32.totalorder %s398_s25, %s660_s4  ;;  %p666_p8 = scmp.lt.s32.totalorder %s660_s4, %s660_s4 }
  0x44   :  { %486 = vmatprep.subr.mxu0 %v90_v16  ;;  %518 = vmatpush3.msra.mxu1 %v196_v19 }
  0x45   :  { %487 = vmatpush3.msra.mxu0 %v90_v16  ;;  %519 = vmatprep.subr.mxu1 %v195_v21  ;;  %p667_p9 = por %p666_p8, %p665_p7 }
  0x46   :  { %488 = vmatprep.subr.mxu0 %v89_v18  ;;  %520 = vmatpush3.msra.mxu1 %v195_v21 }
  0x47   :  { %489 = vmatpush3.msra.mxu0 %v89_v18  ;;  %521 = vmatprep.subr.mxu1 %v194_v23  ;;  %p668_p10 = pnand %p667_p9, %p661_p6 }
  0x48   :  { %490 = vmatprep.subr.mxu0 %v88_v20  ;;  %522 = vmatpush3.msra.mxu1 %v194_v23 }
  0x49   :  { %491 = vmatpush3.msra.mxu0 %v88_v20  ;;  %523 = vmatprep.subr.mxu1 %v193_v25 }
  0x4a   :  { %492 = vmatprep.subr.mxu0 %v87_v22  ;;  %524 = vmatpush3.msra.mxu1 %v193_v25 }
  0x4b   :  { %493 = vmatpush3.msra.mxu0 %v87_v22  ;;  %525 = vmatprep.subr.mxu1 %v192_v27 }
  0x4c   :  { %494 = vmatprep.subr.mxu0 %v86_v24  ;;  %526 = vmatpush3.msra.mxu1 %v192_v27 }
  0x4d   :  { %495 = vmatpush3.msra.mxu0 %v86_v24  ;;  %527 = vmatprep.subr.mxu1 %v191_v30 }
  0x4e   :  { %496 = vmatprep.subr.mxu0 %v85_v26  ;;  %528 = vmatpush3.msra.mxu1 %v191_v30 }
  0x4f   :  { %497 = vmatpush3.msra.mxu0 %v85_v26  ;;  %529 = vmatprep.subr.mxu1 %v190_v31 }
  0x50   :  { %498 = vmatprep.subr.mxu0 %v84_v28  ;;  %530 = vmatpush3.msra.mxu1 %v190_v31 }
  0x51   :  { %499 = vmatpush3.msra.mxu0 %v84_v28  ;;  %531 = vmatprep.subr.mxu1 %v189_v32 }
  0x52   :  { %501 = vmatmul.mubr.f32.vlgmr.msra.gmra.mxu0 %v83_v29  ;;  %532 = vmatpush3.msra.mxu1 %v189_v32 }
  0x53   :  { %533 = vmatprep.subr.mxu1 %v188_v33  ;;  %538 = vmatprep.subr.mxu0 %v307_v34 }
  0x54   :  { %534 = vmatpush3.msra.mxu1 %v188_v33  ;;  %539 = vmatpush3.msra.mxu0 %v307_v34 }
  0x55   :  { %540 = vmatprep.subr.mxu0 %v306_v35 }
  0x56   :  { %541 = vmatpush3.msra.mxu0 %v306_v35 }
  0x57   :  { %542 = vmatprep.subr.mxu0 %v305_v36 }
  0x58   :  { %543 = vmatpush3.msra.mxu0 %v305_v36 }
  0x59   :  { %544 = vmatprep.subr.mxu0 %v304_v37 }
  0x5a   :  { %545 = vmatpush3.msra.mxu0 %v304_v37 }
  0x5b   :  { %546 = vmatprep.subr.mxu0 %v303_v38 }
  0x5c   :  { %547 = vmatpush3.msra.mxu0 %v303_v38 }
  0x5d   :  { %548 = vmatprep.subr.mxu0 %v302_v39 }
  0x5e   :  { %549 = vmatpush3.msra.mxu0 %v302_v39 }
  0x5f   :  { %550 = vmatprep.subr.mxu0 %v301_v40 }
  0x60   :  { %551 = vmatpush3.msra.mxu0 %v301_v40 }
  0x61   :  { %552 = vmatprep.subr.mxu0 %v300_v41 }
  0x62   :  { %553 = vmatpush3.msra.mxu0 %v300_v41 }
  0x63   :  { %554 = vmatprep.subr.mxu0 %v299_v42 }
  0x64   :  { %555 = vmatpush3.msra.mxu0 %v299_v42 }
  0x65   :  { %556 = vmatprep.subr.mxu0 %v298_v43 }
  0x66   :  { %557 = vmatpush3.msra.mxu0 %v298_v43 }
  0x67   :  { %558 = vmatprep.subr.mxu0 %v297_v44 }
  0x68   :  { %559 = vmatpush3.msra.mxu0 %v297_v44 }
  0x69   :  { %560 = vmatprep.subr.mxu0 %v296_v45 }
  0x6a   :  { %561 = vmatpush3.msra.mxu0 %v296_v45 }
  0x6b   :  { %562 = vmatprep.subr.mxu0 %v295_v53 }
  0x6c   :  { %563 = vmatpush3.msra.mxu0 %v295_v53 }
  0x6d   :  { %564 = vmatprep.subr.mxu0 %v294_v54 }
  0x6e   :  { %565 = vmatpush3.msra.mxu0 %v294_v54 }
  0x6f   :  { %566 = vmatprep.subr.mxu0 %v293_v55 }
  0x70   :  { %567 = vmatpush3.msra.mxu0 %v293_v55 }
  0x71   :  { %568 = vmatprep.subr.mxu0 %v292_v56 }
  0x72   :  { %569 = vmatpush3.msra.mxu0 %v292_v56 }
 0x112   :  { %v502_v47 = vpop.f32.mrf.mxu0 }
 0x113   :  { %v179_v48 = vadd.f32 %v502_v47, %v411_v46 }
 0x114   :  { %v173_v49 = vpop.f32.mrf.mxu0 }
 0x115   :  { %v174_v50 = vadd.f32 %v411_v46, %v173_v49  ;;  %v183_v52 = vmax.f32 %v179_v48, 0.0 }
 0x117   :  { %v182_v51 = vmax.f32 %v174_v50, 0.0 }
 0x119   :  { %535 = vmatprep.mubr.f32.mxu1 %v182_v51 }
 0x11a   :  { %536 = vmatmul.mubr.f32.vlgmr.msra.gmra.mxu1 %v183_v52 }
 0x1da   :  { %v537_v58 = vpop.f32.mrf.mxu1 }
 0x1db   :  { %v283_v59 = vadd.f32 %v537_v58, %v412_v57 }
 0x1dc   :  { %v277_v60 = vpop.f32.mrf.mxu1 }
 0x1dd   :  { %v278_v61 = vadd.f32 %v412_v57, %v277_v60  ;;  %v287_v63 = vmax.f32 %v283_v59, 0.0 }
 0x1df   :  { %v286_v62 = vmax.f32 %v278_v61, 0.0 }
 0x1e1   :  { %570 = vmatprep.mubr.f32.mxu0 %v286_v62 }
 0x1e2   :  { %571 = vmatmul.mubr.f32.vlgmr.msra.gmra.mxu0 %v287_v63 }
 0x2a2   :  { %v572_v1 = vpop.f32.mrf.mxu0 }
 0x2a3   :  { %v387_v2 = vadd.f32 %v572_v1, %v413_v0 }
 0x2a4   :  { %v381_v3 = vpop.f32.mrf.mxu0 }
 0x2a5   :  { %391 = vst [vmem:[#allocation12 + $0x8] sm:$0xff] %v387_v2  ;;  %v382_v4 = vadd.f32 %v413_v0, %v381_v3 }
 0x2a7   :  { %390 = vst [vmem:[#allocation12] sm:$0xff] %v382_v4 }
 0x2a8   :  { %671 = shalt.err (!%p668_p10)
}
 0x2a9   :  { %403 = dma.vmem_to_hbm [thread:$0]  %s398_s25, 256, %s781_s7, [#allocation6], %s690_s29, %s690_s29, %s691_s30  }
 0x2aa   :  { %686 = dma.done.wait [#allocation6], 256  }
 0x2ab   :  { %687 = vsyncadd [#allocation6], 4294967040 }
 0x2ac   :  { %407 = vsyncpa [#allocation5], 1 }
 0x2ad   :  { %408 = vsyncpa [#allocation8], 1 }
 0x2ae   :  { %409 = vsyncpa [#allocation11], 1 }
 0x2af   :  { %410 = vsyncpa [#allocation6], 1 }

</bundles_post_ra>
